<compile_context>
chip_gen: v7x
topology: tpu7x:2x2x1
jax: 0.10.0
libtpu: 0.0.40
codegen_flags: <defaults>
</compile_context>

<pallas_src>
import math
import functools

import numpy as np
import jax
import jax.numpy as jnp
from jax import lax
from jax.experimental import pallas as pl
from jax.experimental.pallas import tpu as pltpu


# ----------------------------- Pallas kernel -------------------------------- #

def _spt_kernel(x_ref, cw_ref, cnt_ref, w2f_ref, cs1_ref, cs2_ref, bias_ref,
                o_ref, *, dim, patch_dim, wave_dim):
    """Fused SPT tile:
       x_ref   : (rows, K)        bf16  K = 4*p*p*C quadrant features per patch
       cw_ref  : (K, dim+wpad)    bf16  [LN1-folded Linear1 | Haar detail-mean (0-padded)]
       cnt_ref : (1, K)           f32   multiplicity of each quadrant feature in the
                                        5x shifted token (for exact LN1 statistics)
       w2f_ref : (wpad, dim)      f32   LN2-folded Linear2 weight (zero rows in padding)
       cs1/cs2 : (1, dim)         f32   column sums of folded weights (mean-removal term)
       bias    : (1, dim)         f32   b1' + b2'
    """
    eps = 1e-5
    x = x_ref[...]                                        # (rows, K) bf16
    xf = x.astype(jnp.float32)
    cnt = cnt_ref[...]

    # One MXU pass yields both the merging pre-activation and the wavelet tokens.
    acc = jnp.dot(x, cw_ref[...], preferred_element_type=jnp.float32)   # (rows, dim+wpad)
    raw1 = acc[:, :dim]
    xw = acc[:, dim:]                                     # wavelet tokens, pad lanes == 0

    # LayerNorm-1 statistics over the shifted-token features (multiplicity weighted).
    srow = jnp.sum(xf * cnt, axis=-1, keepdims=True)
    ssq = jnp.sum(xf * xf * cnt, axis=-1, keepdims=True)
    mu1 = srow * (1.0 / patch_dim)
    var1 = ssq * (1.0 / patch_dim) - mu1 * mu1
    inv1 = lax.rsqrt(var1 + eps)
    out = inv1 * (raw1 - mu1 * cs1_ref[...])

    # LayerNorm-2 over the real wave_dim lanes (padded lanes are exactly zero).
    mu2 = jnp.sum(xw, axis=-1, keepdims=True) * (1.0 / wave_dim)
    var2 = jnp.sum(xw * xw, axis=-1, keepdims=True) * (1.0 / wave_dim) - mu2 * mu2
    inv2 = lax.rsqrt(var2 + eps)
    raw2 = jnp.dot(xw, w2f_ref[...], preferred_element_type=jnp.float32)
    out = out + inv2 * (raw2 - mu2 * cs2_ref[...]) + bias_ref[...]

    o_ref[...] = out.astype(o_ref.dtype)


# ------------------------- parameter preparation ----------------------------- #

def _build_haar_detail_mean_matrix(p, C):
    """Exact linear map: flattened (p,p,C) patch -> flattened (p/2,p/2,C) mean of the
    level-1 Haar ('db1') detail subbands (cH,cV,cD): per 2x2 block (3a - b - c - d)/6."""
    pw = p // 2
    M = np.zeros((p * p * C, pw * pw * C), dtype=np.float32)
    for w1 in range(pw):
        for w2 in range(pw):
            for c in range(C):
                k = w1 * pw * C + w2 * C + c
                M[(2 * w1) * p * C + (2 * w2) * C + c, k] = 3.0 / 6.0
                M[(2 * w1) * p * C + (2 * w2 + 1) * C + c, k] = -1.0 / 6.0
                M[(2 * w1 + 1) * p * C + (2 * w2) * C + c, k] = -1.0 / 6.0
                M[(2 * w1 + 1) * p * C + (2 * w2 + 1) * C + c, k] = -1.0 / 6.0
    return M


def init_params(key, in_dim, patch_size, dim):
    """Module-equivalent base parameters (LayerNorm + Linear for both branches)."""
    C5 = 5 * in_dim
    patch_dim = C5 * patch_size ** 2
    wave_dim = patch_dim // 4
    ks = jax.random.split(key, 8)
    return dict(
        g1=1.0 + 0.1 * jax.random.normal(ks[0], (patch_dim,), jnp.float32),
        beta1=0.05 * jax.random.normal(ks[1], (patch_dim,), jnp.float32),
        w1=jax.random.normal(ks[2], (patch_dim, dim), jnp.float32) / np.sqrt(patch_dim),
        b1=0.02 * jax.random.normal(ks[3], (dim,), jnp.float32),
        g2=1.0 + 0.1 * jax.random.normal(ks[4], (wave_dim,), jnp.float32),
        beta2=0.05 * jax.random.normal(ks[5], (wave_dim,), jnp.float32),
        w2=jax.random.normal(ks[6], (wave_dim, dim), jnp.float32) / np.sqrt(wave_dim),
        b2=0.02 * jax.random.normal(ks[7], (dim,), jnp.float32),
    )


def prepare_kernel_params(base, *, in_dim, patch_size, dim):
    """One-time host prep: fold LN affines into the Linear weights, fold the Haar map,
    and re-index everything from the 5x-shifted token feature space onto the 4-quadrant
    padded-image patch-grid feature space that the kernel consumes."""
    p = patch_size
    C = in_dim
    sh = p // 2
    C5 = 5 * C
    patch_dim = C5 * p * p
    wave_dim = patch_dim // 4
    wpad = ((wave_dim + 127) // 128) * 128
    ppC = p * p * C
    K = 4 * ppC

    g1 = np.asarray(base["g1"], np.float32)
    beta1 = np.asarray(base["beta1"], np.float32)
    w1 = np.asarray(base["w1"], np.float32)
    b1 = np.asarray(base["b1"], np.float32)
    g2 = np.asarray(base["g2"], np.float32)
    beta2 = np.asarray(base["beta2"], np.float32)
    w2 = np.asarray(base["w2"], np.float32)
    b2 = np.asarray(base["b2"], np.float32)

    # LayerNorm affine folded into the Linear layers.
    w1f = w1 * g1[:, None]                       # (patch_dim, dim)
    b1f = b1 + beta1 @ w1                        # (dim,)
    w2f = w2 * g2[:, None]                       # (wave_dim, dim)
    b2f = b2 + beta2 @ w2

    haar = _build_haar_detail_mean_matrix(p, C5)                 # (patch_dim, wave_dim)
    haar_pad = np.zeros((patch_dim, wpad), np.float32)
    haar_pad[:, :wave_dim] = haar

    # Re-index every shifted-token feature (p1, p2, shift-group, c) onto
    # (quadrant, within-patch feature) of the padded image's non-overlapping
    # p x p patch grid.  Overlapping shift windows hit the same pixel several
    # times -> accumulate rows and track multiplicities for the LN1 statistics.
    w1q = np.zeros((K, dim), np.float32)
    hq = np.zeros((K, wpad), np.float32)
    cnt = np.zeros((K,), np.float32)
    offs = [(sh, sh), (0, 0), (0, 2 * sh), (2 * sh, 0), (2 * sh, 2 * sh)]  # x,lu,ru,lb,rb
    for p1 in range(p):
        for p2 in range(p):
            for g, (dy, dx) in enumerate(offs):
                u, v = p1 + dy, p2 + dx
                quad = (u // p) * 2 + (v // p)
                row0 = quad * ppC + ((u % p) * p + (v % p)) * C
                f0 = p1 * (p * C5) + p2 * C5 + g * C
                for c in range(C):
                    w1q[row0 + c] += w1f[f0 + c]
                    hq[row0 + c] += haar_pad[f0 + c]
                    cnt[row0 + c] += 1.0
    assert int(cnt.sum()) == patch_dim

    cw = np.concatenate([w1q, hq], axis=1)                       # (K, dim + wpad)
    w2f_pad = np.zeros((wpad, dim), np.float32)
    w2f_pad[:wave_dim] = w2f

    return dict(
        cw=jnp.asarray(cw, jnp.bfloat16),
        cnt=jnp.asarray(cnt[None, :], jnp.float32),
        w2f=jnp.asarray(w2f_pad, jnp.float32),
        cs1=jnp.asarray(w1f.sum(0)[None, :], jnp.float32),
        cs2=jnp.asarray(w2f.sum(0)[None, :], jnp.float32),
        bias=jnp.asarray((b1f + b2f)[None, :], jnp.float32),
    )


# ------------------------------ JAX wrapper ---------------------------------- #

def _pick_row_tile(r):
    for cand in (512, 256, 128, 64, 32, 16, 8):
        if r % cand == 0 and r // cand >= 2:
            return cand
    for cand in (512, 256, 128, 64, 32, 16, 8):
        if r % cand == 0:
            return cand
    return r


def shifted_patch_tokenization(x, kparams, *, patch_size):
    """SPT forward (exist_class_t=False, is_pe=False path of the PyTorch module)."""
    B, N, Cin = x.shape
    H = W = int(math.sqrt(N))
    p = patch_size
    sh = p // 2
    Hp, Wp = H // p, W // p
    ppC = p * p * Cin
    K = 4 * ppC

    cw = kparams["cw"]
    dim = kparams["bias"].shape[-1]
    dim_wpad = cw.shape[1]
    wpad = dim_wpad - dim
    patch_dim = 5 * ppC
    wave_dim = patch_dim // 4

    # --- data movement: single padded image, patch-blocked once (bf16) --------- #
    # 'b (h w) d -> b d h w', zero-pad by p//2.
    img = jnp.transpose(x, (0, 2, 1)).reshape(B, Cin, H, W).astype(jnp.bfloat16)
    xpad = jnp.pad(img, ((0, 0), (0, 0), (sh, sh), (sh, sh)))  # (B,C,(Hp+1)p,(Wp+1)p)

    # Non-overlapping p x p patch grid of the padded image, feature order (r1, r2, c).
    qgrid = xpad.reshape(B, Cin, Hp + 1, p, Wp + 1, p)
    qgrid = jnp.transpose(qgrid, (0, 2, 4, 3, 5, 1)).reshape(B, Hp + 1, Wp + 1, ppC)

    # All 5 shifted windows of a patch live inside its 2x2 quadrant neighbourhood of
    # this grid, so 4 offset views replace the 5x shifted concat + rearrange; the 5-way
    # expansion itself is folded into the kernel weight `cw`.
    quads = [qgrid[:, q1:q1 + Hp, q2:q2 + Wp, :] for q1 in (0, 1) for q2 in (0, 1)]
    xq = jnp.concatenate(quads, axis=-1).reshape(B * Hp * Wp, K)      # (R, K) bf16

    R = B * Hp * Wp
    row_tile = _pick_row_tile(R)
    grid = (R // row_tile,)

    # VMEM budget (double-buffered tiles + resident weights), generous margin; stays
    # far below v7x's 64 MiB per-core VMEM.
    weight_bytes = K * dim_wpad * 2 + K * 4 + wpad * dim * 4 + 3 * dim * 4
    io_bytes = 2 * (row_tile * K * 2 + row_tile * dim * 4)
    vmem_limit = int(min(48 * 1024 * 1024,
                         max(8 * 1024 * 1024, 4 * (2 * weight_bytes + io_bytes))))

    cost = pl.CostEstimate(
        flops=int(2 * R * K * dim_wpad + 2 * R * wpad * dim + 6 * R * K),
        transcendentals=int(2 * R),
        bytes_accessed=int(R * K * 2 + weight_bytes + R * dim * 4),
    )

    out = pl.pallas_call(
        functools.partial(_spt_kernel, dim=dim, patch_dim=patch_dim, wave_dim=wave_dim),
        out_shape=jax.ShapeDtypeStruct((R, dim), jnp.float32),
        grid=grid,
        in_specs=[
            pl.BlockSpec((row_tile, K), lambda i: (i, 0)),            # quadrant tokens
            pl.BlockSpec((K, dim_wpad), lambda i: (0, 0)),            # fused weight
            pl.BlockSpec((1, K), lambda i: (0, 0)),                   # multiplicities
            pl.BlockSpec((wpad, dim), lambda i: (0, 0)),              # Linear2 weight
            pl.BlockSpec((1, dim), lambda i: (0, 0)),                 # colsum(w1')
            pl.BlockSpec((1, dim), lambda i: (0, 0)),                 # colsum(w2')
            pl.BlockSpec((1, dim), lambda i: (0, 0)),                 # fused bias
        ],
        out_specs=pl.BlockSpec((row_tile, dim), lambda i: (i, 0)),
        compiler_params=pltpu.CompilerParams(
            dimension_semantics=("parallel",),
            vmem_limit_bytes=vmem_limit,
        ),
        cost_estimate=cost,
    )(xq, cw, kparams["cnt"], kparams["w2f"],
      kparams["cs1"], kparams["cs2"], kparams["bias"])

    return out.reshape(B, Hp * Wp, dim)


# -------------------------- pure-JAX reference ------------------------------- #

def _rearrange_patches(x, p):
    """'b c (h p1) (w p2) -> b (h w) (p1 p2 c)'  (pure reshape/transpose)."""
    B, C, H, W = x.shape
    hp, wp = H // p, W // p
    x = x.reshape(B, C, hp, p, wp, p)
    x = jnp.transpose(x, (0, 2, 4, 3, 5, 1))
    return x.reshape(B, hp * wp, p * p * C)


def _patch_shift_cat(img, shift):
    """PatchShifting: zero-pad by `shift`, concat [x, lu, ru, lb, rb] on channels."""
    B, C, H, W = img.shape
    xp = jnp.pad(img, ((0, 0), (0, 0), (shift, shift), (shift, shift)))
    s2 = 2 * shift
    x_lu = xp[:, :, :H, :W]
    x_ru = xp[:, :, :H, s2:s2 + W]
    x_lb = xp[:, :, s2:s2 + H, :W]
    x_rb = xp[:, :, s2:s2 + H, s2:s2 + W]
    return jnp.concatenate([img, x_lu, x_ru, x_lb, x_rb], axis=1)


def reference_forward(x, params, *, patch_size):
    B, N, in_dim = x.shape
    H = W = int(math.sqrt(N))
    shift = patch_size // 2
    img = jnp.transpose(x, (0, 2, 1)).reshape(B, in_dim, H, W)
    cat = _patch_shift_cat(img, shift)

    # Haar level-1 detail (cH,cV,cD) mean, computed directly on the image.
    a = cat[:, :, 0::2, 0::2]
    b = cat[:, :, 0::2, 1::2]
    c = cat[:, :, 1::2, 0::2]
    d = cat[:, :, 1::2, 1::2]
    waves = (3.0 * a - b - c - d) / 6.0

    tf_ = _rearrange_patches(cat, patch_size)
    tw_ = _rearrange_patches(waves, patch_size // 2)

    def layer_norm(xx, g, bb, eps=1e-5):
        mu = xx.mean(-1, keepdims=True)
        var = ((xx - mu) ** 2).mean(-1, keepdims=True)
        return (xx - mu) / jnp.sqrt(var + eps) * g + bb

    out = layer_norm(tf_, params["g1"], params["beta1"]) @ params["w1"] + params["b1"]
    out = out + layer_norm(tw_, params["g2"], params["beta2"]) @ params["w2"] + params["b2"]
    return out


# --------------------------------- main --------------------------------------- #

if __name__ == "__main__":
    # small shapes: B=2, in_dim=4 channels, 16x16 spatial -> 256 tokens, patch 4, dim 128
    B, in_dim, H, W = 2, 4, 16, 16
    patch_size, dim = 4, 128

    key = jax.random.PRNGKey(0)
    kx, kp = jax.random.split(key)
    x = jax.random.normal(kx, (B, H * W, in_dim), jnp.float32)
    # Quantize inputs to bf16-representable values so kernel-vs-reference differences
    # come only from the (bf16-weight, f32-accumulate) kernel arithmetic.
    x = x.astype(jnp.bfloat16).astype(jnp.float32)

    base = init_params(kp, in_dim, patch_size, dim)
    kparams = prepare_kernel_params(base, in_dim=in_dim, patch_size=patch_size, dim=dim)

    fn = jax.jit(functools.partial(shifted_patch_tokenization, patch_size=patch_size))
    out = jax.block_until_ready(fn(x, kparams))

    ref = reference_forward(x, base, patch_size=patch_size)
    assert out.shape == (B, (H // patch_size) * (W // patch_size), dim)
    np.testing.assert_allclose(np.asarray(out), np.asarray(ref), rtol=2e-2, atol=2e-2)

    print("KERNEL_OK")
</pallas_src>

<mosaic_0001>
module attributes {stable_mosaic.version = 11 : i64} {
  func.func @_spt_kernel(%arg0: i32, %arg1: memref<16x256xbf16, #tpu.memory_space<vmem>>, %arg2: memref<256x256xbf16, #tpu.memory_space<vmem>>, %arg3: memref<1x256xf32, #tpu.memory_space<vmem>>, %arg4: memref<128x128xf32, #tpu.memory_space<vmem>>, %arg5: memref<1x128xf32, #tpu.memory_space<vmem>>, %arg6: memref<1x128xf32, #tpu.memory_space<vmem>>, %arg7: memref<1x128xf32, #tpu.memory_space<vmem>>, %arg8: memref<16x128xf32, #tpu.memory_space<vmem>>) attributes {dimension_semantics = [#tpu.dimension_semantics<parallel>], iteration_bounds = array<i64: 2>, scalar_prefetch = 0 : i64, scratch_operands = 0 : i64, tpu.core_type = #tpu.core_type<tc>, window_params = [{transform_indices = @transform_0, window_bounds = array<i64: 16, 256>}, {pipeline_mode = #tpu.pipeline_mode<synchronous>, transform_indices = @transform_1, window_bounds = array<i64: 256, 256>}, {pipeline_mode = #tpu.pipeline_mode<synchronous>, transform_indices = @transform_2, window_bounds = array<i64: 1, 256>}, {pipeline_mode = #tpu.pipeline_mode<synchronous>, transform_indices = @transform_3, window_bounds = array<i64: 128, 128>}, {pipeline_mode = #tpu.pipeline_mode<synchronous>, transform_indices = @transform_4, window_bounds = array<i64: 1, 128>}, {pipeline_mode = #tpu.pipeline_mode<synchronous>, transform_indices = @transform_5, window_bounds = array<i64: 1, 128>}, {pipeline_mode = #tpu.pipeline_mode<synchronous>, transform_indices = @transform_6, window_bounds = array<i64: 1, 128>}, {transform_indices = @transform_7, window_bounds = array<i64: 16, 128>}]} {
    %c0 = arith.constant 0 : index
    %c0_0 = arith.constant 0 : index
    %0 = vector.load %arg1[%c0, %c0_0] : memref<16x256xbf16, #tpu.memory_space<vmem>>, vector<16x256xbf16>
    %1 = arith.extf %0 : vector<16x256xbf16> to vector<16x256xf32>
    %c0_1 = arith.constant 0 : index
    %c0_2 = arith.constant 0 : index
    %2 = vector.load %arg3[%c0_1, %c0_2] : memref<1x256xf32, #tpu.memory_space<vmem>>, vector<1x256xf32>
    %c0_3 = arith.constant 0 : index
    %c0_4 = arith.constant 0 : index
    %3 = vector.load %arg2[%c0_3, %c0_4] : memref<256x256xbf16, #tpu.memory_space<vmem>>, vector<256x256xbf16>
    %cst = arith.constant dense<0.000000e+00> : vector<16x256xf32>
    %4 = tpu.matmul %0, %3, %cst {dimension_numbers = #tpu.dot_dimension_numbers<[1], [0], [0], [1], [0, 0, 1, 1], [], []>} : vector<16x256xbf16>, vector<256x256xbf16>, vector<16x256xf32> -> vector<16x256xf32>
    %5 = vector.extract_strided_slice %4 {offsets = [0, 0], sizes = [16, 128], strides = [1, 1]} : vector<16x256xf32> to vector<16x128xf32>
    %6 = vector.extract_strided_slice %4 {offsets = [0, 128], sizes = [16, 128], strides = [1, 1]} : vector<16x256xf32> to vector<16x128xf32>
    %7 = vector.broadcast %2 : vector<1x256xf32> to vector<16x256xf32>
    %8 = arith.mulf %1, %7 : vector<16x256xf32>
    %cst_5 = arith.constant dense<0.000000e+00> : vector<16xf32>
    %9 = vector.multi_reduction <add>, %8, %cst_5 [1] : vector<16x256xf32> to vector<16xf32>
    %10 = vector.shape_cast %9 : vector<16xf32> to vector<16x1xf32>
    %11 = arith.mulf %1, %1 : vector<16x256xf32>
    %12 = vector.broadcast %2 : vector<1x256xf32> to vector<16x256xf32>
    %13 = arith.mulf %11, %12 : vector<16x256xf32>
    %cst_6 = arith.constant dense<0.000000e+00> : vector<16xf32>
    %14 = vector.multi_reduction <add>, %13, %cst_6 [1] : vector<16x256xf32> to vector<16xf32>
    %15 = vector.shape_cast %14 : vector<16xf32> to vector<16x1xf32>
    %cst_7 = arith.constant 3.125000e-03 : f32
    %16 = vector.broadcast %cst_7 : f32 to vector<16x1xf32>
    %17 = arith.mulf %10, %16 : vector<16x1xf32>
    %cst_8 = arith.constant 3.125000e-03 : f32
    %18 = vector.broadcast %cst_8 : f32 to vector<16x1xf32>
    %19 = arith.mulf %15, %18 : vector<16x1xf32>
    %20 = arith.mulf %17, %17 : vector<16x1xf32>
    %21 = arith.subf %19, %20 : vector<16x1xf32>
    %cst_9 = arith.constant 9.99999974E-6 : f32
    %22 = vector.broadcast %cst_9 : f32 to vector<16x1xf32>
    %23 = arith.addf %21, %22 : vector<16x1xf32>
    %24 = math.rsqrt %23 : vector<16x1xf32>
    %c0_10 = arith.constant 0 : index
    %c0_11 = arith.constant 0 : index
    %25 = vector.load %arg5[%c0_10, %c0_11] : memref<1x128xf32, #tpu.memory_space<vmem>>, vector<1x128xf32>
    %26 = vector.broadcast %17 : vector<16x1xf32> to vector<16x128xf32>
    %27 = vector.broadcast %25 : vector<1x128xf32> to vector<16x128xf32>
    %28 = arith.mulf %26, %27 : vector<16x128xf32>
    %29 = arith.subf %5, %28 : vector<16x128xf32>
    %30 = vector.broadcast %24 : vector<16x1xf32> to vector<16x128xf32>
    %31 = arith.mulf %30, %29 : vector<16x128xf32>
    %cst_12 = arith.constant dense<0.000000e+00> : vector<16xf32>
    %32 = vector.multi_reduction <add>, %6, %cst_12 [1] : vector<16x128xf32> to vector<16xf32>
    %33 = vector.shape_cast %32 : vector<16xf32> to vector<16x1xf32>
    %cst_13 = arith.constant 1.250000e-02 : f32
    %34 = vector.broadcast %cst_13 : f32 to vector<16x1xf32>
    %35 = arith.mulf %33, %34 : vector<16x1xf32>
    %36 = arith.mulf %6, %6 : vector<16x128xf32>
    %cst_14 = arith.constant dense<0.000000e+00> : vector<16xf32>
    %37 = vector.multi_reduction <add>, %36, %cst_14 [1] : vector<16x128xf32> to vector<16xf32>
    %38 = vector.shape_cast %37 : vector<16xf32> to vector<16x1xf32>
    %cst_15 = arith.constant 1.250000e-02 : f32
    %39 = vector.broadcast %cst_15 : f32 to vector<16x1xf32>
    %40 = arith.mulf %38, %39 : vector<16x1xf32>
    %41 = arith.mulf %35, %35 : vector<16x1xf32>
    %42 = arith.subf %40, %41 : vector<16x1xf32>
    %cst_16 = arith.constant 9.99999974E-6 : f32
    %43 = vector.broadcast %cst_16 : f32 to vector<16x1xf32>
    %44 = arith.addf %42, %43 : vector<16x1xf32>
    %45 = math.rsqrt %44 : vector<16x1xf32>
    %c0_17 = arith.constant 0 : index
    %c0_18 = arith.constant 0 : index
    %46 = vector.load %arg4[%c0_17, %c0_18] : memref<128x128xf32, #tpu.memory_space<vmem>>, vector<128x128xf32>
    %cst_19 = arith.constant dense<0.000000e+00> : vector<16x128xf32>
    %47 = tpu.matmul %6, %46, %cst_19 {dimension_numbers = #tpu.dot_dimension_numbers<[1], [0], [0], [1], [0, 0, 1, 1], [], []>} : vector<16x128xf32>, vector<128x128xf32>, vector<16x128xf32> -> vector<16x128xf32>
    %c0_20 = arith.constant 0 : index
    %c0_21 = arith.constant 0 : index
    %48 = vector.load %arg6[%c0_20, %c0_21] : memref<1x128xf32, #tpu.memory_space<vmem>>, vector<1x128xf32>
    %49 = vector.broadcast %35 : vector<16x1xf32> to vector<16x128xf32>
    %50 = vector.broadcast %48 : vector<1x128xf32> to vector<16x128xf32>
    %51 = arith.mulf %49, %50 : vector<16x128xf32>
    %52 = arith.subf %47, %51 : vector<16x128xf32>
    %53 = vector.broadcast %45 : vector<16x1xf32> to vector<16x128xf32>
    %54 = arith.mulf %53, %52 : vector<16x128xf32>
    %55 = arith.addf %31, %54 : vector<16x128xf32>
    %c0_22 = arith.constant 0 : index
    %c0_23 = arith.constant 0 : index
    %56 = vector.load %arg7[%c0_22, %c0_23] : memref<1x128xf32, #tpu.memory_space<vmem>>, vector<1x128xf32>
    %57 = vector.broadcast %56 : vector<1x128xf32> to vector<16x128xf32>
    %58 = arith.addf %55, %57 : vector<16x128xf32>
    %c0_24 = arith.constant 0 : index
    %c0_25 = arith.constant 0 : index
    %59 = vector.load %arg8[%c0_24, %c0_25] : memref<16x128xf32, #tpu.memory_space<vmem>>, vector<16x128xf32>
    tpu.vector_store %arg8[%c0_24, %c0_25], %58 {strides = array<i32>} : memref<16x128xf32, #tpu.memory_space<vmem>>, vector<16x128xf32>,
    return
  }
  func.func @transform_0(%arg0: i32) -> (i32, i32) {
    %c0_i32 = arith.constant 0 : i32
    %c0_i32_0 = arith.constant 0 : i32
    return %arg0, %c0_i32 : i32, i32
  }
  func.func @transform_1(%arg0: i32) -> (i32, i32) {
    %c0_i32 = arith.constant 0 : i32
    %c0_i32_0 = arith.constant 0 : i32
    %c0_i32_1 = arith.constant 0 : i32
    return %c0_i32, %c0_i32_0 : i32, i32
  }
  func.func @transform_2(%arg0: i32) -> (i32, i32) {
    %c0_i32 = arith.constant 0 : i32
    %c0_i32_0 = arith.constant 0 : i32
    %c0_i32_1 = arith.constant 0 : i32
    return %c0_i32, %c0_i32_0 : i32, i32
  }
  func.func @transform_3(%arg0: i32) -> (i32, i32) {
    %c0_i32 = arith.constant 0 : i32
    %c0_i32_0 = arith.constant 0 : i32
    %c0_i32_1 = arith.constant 0 : i32
    return %c0_i32, %c0_i32_0 : i32, i32
  }
  func.func @transform_4(%arg0: i32) -> (i32, i32) {
    %c0_i32 = arith.constant 0 : i32
    %c0_i32_0 = arith.constant 0 : i32
    %c0_i32_1 = arith.constant 0 : i32
    return %c0_i32, %c0_i32_0 : i32, i32
  }
  func.func @transform_5(%arg0: i32) -> (i32, i32) {
    %c0_i32 = arith.constant 0 : i32
    %c0_i32_0 = arith.constant 0 : i32
    %c0_i32_1 = arith.constant 0 : i32
    return %c0_i32, %c0_i32_0 : i32, i32
  }
  func.func @transform_6(%arg0: i32) -> (i32, i32) {
    %c0_i32 = arith.constant 0 : i32
    %c0_i32_0 = arith.constant 0 : i32
    %c0_i32_1 = arith.constant 0 : i32
    return %c0_i32, %c0_i32_0 : i32, i32
  }
  func.func @transform_7(%arg0: i32) -> (i32, i32) {
    %c0_i32 = arith.constant 0 : i32
    %c0_i32_0 = arith.constant 0 : i32
    return %arg0, %c0_i32 : i32, i32
  }
}

</mosaic_0001>

<bundles_post_ra>
// kernel: shifted_patch_tokenization.1
= control target key start
LH: loop header
LB: loop body
LE: loop exit
PB: predicated region body
PF: predicated region fallthrough
CT: control target
= control target key end

     0   :  { %12 = vsyncpa [#allocation3], 0  ;;  %s1430_s0 = inlined_call_operand.vmem [shape: bf16[32,256], index: 0, kind: input, shape index: {}]   ;;  %s1431_s1 = inlined_call_operand.vmem [shape: bf16[256,256], index: 1, kind: input, shape index: {}]   ;;  %s1432_s2 = inlined_call_operand.vmem [shape: f32[1,256], index: 2, kind: input, shape index: {}]   ;;  %s1433_s3 = inlined_call_operand.vmem [shape: f32[128,128], index: 3, kind: input, shape index: {}]   ;;  %s1434_s4 = inlined_call_operand.vmem [shape: f32[1,128], index: 4, kind: input, shape index: {}]   ;;  %s1435_s5 = inlined_call_operand.vmem [shape: f32[1,128], index: 5, kind: input, shape index: {}]   ;;  %s1436_s6 = inlined_call_operand.vmem [shape: f32[1,128], index: 6, kind: input, shape index: {}]   ;;  %s1437_s7 = inlined_call_operand.hbm [shape: f32[32,128], index: 7, kind: output, shape index: {}]  }
   0x1   :  { %14 = vsyncpa [#allocation3 + $0x1], 0  ;;  %s1153_s24 = smov 0   ;;  %s1155_s25 = smov 0  }
   0x2   :  { %s1157_s26 = smov 0   ;;  %s1159_s27 = smov 0  }
   0x3 LB: > { %s1174_s28 = sadd.s32 4294967295, %s1108_s27   ;;  %s810_s29 = sadd.s32 4294967294, %s1108_s27   ;;  %s1108_s27 = sphi %s1159_s27, %s1443_s27   ;;  %s1104_s26 = sphi %s1157_s26, %s1442_s26   ;;  %s1100_s25 = sphi %s1155_s25, %s1441_s25   ;;  %s1096_s24 = sphi %s1153_s24, %s1440_s24  }
   0x4   : > { %s1178_s30 = sadd.s32 1, %s1108_s27   ;;  %s179_s8 = sadd.s32 1, %s1104_s26 }
   0x5   : > { %s176_s9 = ssub.s32 %s1108_s27, %s1178_s30  ;;  %p189_p0 = scmp.ne.s32.totalorder %s1104_s26, %s1100_s25 }
   0x6   : > { %p177_p1 = scmp.eq.s32.totalorder %s176_s9, 0  ;;  %p190_p2 = scmp.eq.s32.totalorder %s1174_s28, 1 }
   0x7   : > { %p195_p3 = scmp.ne.s32.totalorder %s1100_s25, %s1096_s24  ;;  %p196_p4 = scmp.eq.s32.totalorder %s810_s29, 1 }
   0x8   : > { %s1189_s10 = scalar_select %p177_p1, %s1104_s26, %s179_s8  }
   0x9   : > { %p1191_p5 = por %p190_p2, %p189_p0  ;;  %p1195_p6 = por %p196_p4, %p195_p3 }
   0xa   : > { %p813_p7 = scmp.ge.s32.totalorder %s1108_s27, 1  ;;  %p242_p8 = scmp.lt.s32.totalorder %s1108_s27, 3 }
   0xc   : > { %p243_p9 = pnand %p813_p7, %p242_p8 }
   0xd   : > { %v988_v0 = vld [vmem:[%s1431_s1 + $0x4] ss:$8 sps:$4 sm:$0xff] (!%p243_p9)   ;;  %v990_v1 = vld [vmem:[%s1431_s1] ss:$8 sps:$4 sm:$0xff] (!%p243_p9)   ;;  %v991_v2 = vld [vmem:[%s1431_s1 + $0x14] ss:$8 sps:$4 sm:$0xff] (!%p243_p9)   ;;  %v536_v8 = vlaneseq (!%p243_p9) }
   0xe   : > { %246 = sbr.rel (%p243_p9) target bundleno = 529 (0x211), region = 48  ;;  %492 = vmatprep.subr.bf16.mxu0 (!%p243_p9), %v988_v0  ;;  %v993_v3 = vld [vmem:[%s1431_s1 + $0x10] ss:$8 sps:$4 sm:$0xff] (!%p243_p9)   ;;  %v994_v4 = vld [vmem:[%s1431_s1 + $0x24] ss:$8 sps:$4 sm:$0xff] (!%p243_p9)   ;;  %s815_s23 = sshll.u32 (!%p243_p9), %s1174_s28, 1 }
   0xf   : > { %493 = vmatpush1.bf16.msra.mxu0 (!%p243_p9), %v990_v1  ;;  %v996_v5 = vld [vmem:[%s1431_s1 + $0x20] ss:$8 sps:$4 sm:$0xff] (!%p243_p9)   ;;  %p276_p10 = scmp.lt.s32.totalorder (!%p243_p9), %s815_s23, 3  ;;  %v997_v6 = vld [vmem:[%s1431_s1 + $0x34] ss:$8 sps:$4 sm:$0xff] (!%p243_p9)   ;;  %v537_v11 = vshrl.u32 (!%p243_p9), %v536_v8, 7 }
  0x10   : > { %494 = vmatprep.subr.bf16.mxu0 (!%p243_p9), %v991_v2  ;;  %v999_v7 = vld [vmem:[%s1431_s1 + $0x30] ss:$8 sps:$4 sm:$0xff] (!%p243_p9)   ;;  %v1000_v9 = vld [vmem:[%s1431_s1 + $0x44] ss:$8 sps:$4 sm:$0xff] (!%p243_p9)   ;;  %v1002_v10 = vld [vmem:[%s1431_s1 + $0x40] ss:$8 sps:$4 sm:$0xff] (!%p243_p9)  }
  0x11   : > { %v1003_v12 = vld [vmem:[%s1431_s1 + $0x54] ss:$8 sps:$4 sm:$0xff] (!%p243_p9)   ;;  %v1005_v13 = vld [vmem:[%s1431_s1 + $0x50] ss:$8 sps:$4 sm:$0xff] (!%p243_p9)   ;;  %v538_v14 = vsub.s32 (!%p243_p9), 0, %v537_v11  ;;  %v542_v15 = vsub.s32 (!%p243_p9), 1, %v537_v11 }
  0x12   : > { %v1006_v16 = vld [vmem:[%s1431_s1 + $0x64] ss:$8 sps:$4 sm:$0xff] (!%p243_p9)   ;;  %v289_v22 = vld [vmem:[%s1432_s2] sm:$0x3] (!%p243_p9)  ;;  %v1009_v30 = vld [vmem:[%s1431_s1 + $0x74] ss:$8 sps:$4 sm:$0xff] (!%p243_p9)  }
  0x13   : > { %495 = vmatpush1.bf16.msra.mxu0 (!%p243_p9), %v993_v3  ;;  %v617_v23 = vld [vmem:[%s1433_s3] sm:$0xff] (!%p243_p9)  ;;  %v618_v24 = vld [vmem:[%s1433_s3 + $0x8] sm:$0xff] (!%p243_p9)  ;;  %v539_v26 = vrot.slane (!%p243_p9), %v289_v22, %v538_v14  ;;  %v543_v27 = vrot.slane (!%p243_p9), %v289_v22, %v542_v15  ;;  %v619_v34 = vld [vmem:[%s1433_s3 + $0x10] sm:$0xff] (!%p243_p9)  ;;  %s861_s13 = sshll.u32 (!%p243_p9), %s1174_s28, 8  ;;  %s1110_s19 = smov (!%p243_p9), [#allocation2]  }
  0x14   : > { %496 = vmatprep.subr.bf16.mxu0 (!%p243_p9), %v994_v4  ;;  %v1008_v25 = vld [vmem:[%s1431_s1 + $0x60] ss:$8 sps:$4 sm:$0xff] (!%p243_p9)   ;;  %v915_v33 = vpack.c.bf16 (!%p243_p9), %v618_v24, %v617_v23  ;;  %v620_v35 = vld [vmem:[%s1433_s3 + $0x18] sm:$0xff] (!%p243_p9)  ;;  %v1012_v45 = vld [vmem:[%s1431_s1 + $0x84] ss:$8 sps:$4 sm:$0xff] (!%p243_p9)   ;;  %s1383_s17 = scalar_lea.hbm (!%p243_p9), %s1437_s7, %s861_s13  ;;  %s1050_s21 = sshll.u32 (!%p243_p9), %s1110_s19, 4  ;;  %s1051_s21 = int_to_ptr.vmem [resolvable:$false] %s1050_s21 }
  0x15   : > { %s1445_s23 = smov (!%p276_p10, %s815_s23), 3  ;;  %v1011_v42 = vld [vmem:[%s1431_s1 + $0x70] ss:$8 sps:$4 sm:$0xff]   ;;  %v919_v44 = vpack.c.bf16 %v620_v35, %v619_v34  ;;  %v1014_v52 = vld [vmem:[%s1431_s1 + $0x80] ss:$8 sps:$4 sm:$0xff]   ;;  %s1052_s22 = scalar_lea.vmem %s1051_s21, 512 }
  0x16   : > { %s860_s20 = sshll.u32 %s1445_s23, 3  ;;  %916 = vmatprep.subr.bf16.mxu1 %v915_v33  ;;  %v1015_v53 = vld [vmem:[%s1431_s1 + $0x94] ss:$8 sps:$4 sm:$0xff]   ;;  %v1017_v55 = vld [vmem:[%s1431_s1 + $0x90] ss:$8 sps:$4 sm:$0xff]   ;;  %v621_v61 = vld [vmem:[%s1433_s3 + $0x20] sm:$0xff] }
  0x17   : > { %497 = vmatpush1.bf16.msra.mxu0 %v996_v5  ;;  %s280_s9 = scalar_lea.vmem %s1430_s0, %s860_s20  ;;  %918 = vmatpush3.bf16.msra.mxu1 %v915_v33  ;;  %v1018_v56 = vld [vmem:[%s1431_s1 + $0xa4] ss:$8 sps:$4 sm:$0xff]   ;;  %v1020_v57 = vld [vmem:[%s1431_s1 + $0xa0] ss:$8 sps:$4 sm:$0xff]   ;;  %v1021_v58 = vld [vmem:[%s1431_s1 + $0xb4] ss:$8 sps:$4 sm:$0xff]  }
  0x18   : > { %498 = vmatprep.subr.bf16.mxu0 %v997_v6  ;;  %v1244_v17 = vld [vmem:[%s280_s9] sm:$0xff]  ;;  %v1246_v18 = vld [vmem:[%s280_s9 + $0x8] sm:$0xff]  ;;  %920 = vmatprep.subr.bf16.mxu1 %v919_v44  ;;  %v1023_v59 = vld [vmem:[%s1431_s1 + $0xb0] ss:$8 sps:$4 sm:$0xff]   ;;  %s272_s20 = sand.u32 1, %s1100_s25  }
  0x19   : > { %v819_v19 = vcombine.high %v1244_v17, %v1246_v18  ;;  %v285_v20 = vunpack.c.l.bf16 %v1244_v17  ;;  %v286_v21 = vunpack.c.h.bf16 %v1244_v17  ;;  %v287_v28 = vunpack.c.l.bf16 %v1246_v18  ;;  %v1024_v60 = vld [vmem:[%s1431_s1 + $0xc4] ss:$8 sps:$4 sm:$0xff]   ;;  %v1026_v0 = vld [vmem:[%s1431_s1 + $0xc0] ss:$8 sps:$4 sm:$0xff]   ;;  %v1027_v1 = vld [vmem:[%s1431_s1 + $0xd4] ss:$8 sps:$4 sm:$0xff]  }
  0x1a   : > { %v288_v29 = vunpack.c.h.bf16 %v1246_v18  ;;  %v622_v62 = vld [vmem:[%s1433_s3 + $0x28] sm:$0xff]  ;;  %v623_v2 = vld [vmem:[%s1433_s3 + $0x30] sm:$0xff]  ;;  %v624_v3 = vld [vmem:[%s1433_s3 + $0x38] sm:$0xff]  ;;  %s814_s29 = sshll.u32 %s272_s20, 4  ;;  %s1389_s28 = scalar_lea.sflag [#allocation3], %s272_s20 }
  0x1b   : > { %499 = vmatpush1.bf16.msra.mxu0 %v999_v7  ;;  %524 = vmatprep.mubr.bf16.mxu0 %v819_v19  ;;  %v556_v31 = vmul.f32 %v285_v20, %v285_v20  ;;  %v557_v32 = vmul.f32 %v286_v21, %v286_v21  ;;  %v546_v36 = vmul.f32 %v539_v26, %v285_v20  ;;  %v1029_v5 = vld [vmem:[%s1431_s1 + $0xd0] ss:$8 sps:$4 sm:$0xff]   ;;  %v1030_v6 = vld [vmem:[%s1431_s1 + $0xe4] ss:$8 sps:$4 sm:$0xff]   ;;  %v1032_v7 = vld [vmem:[%s1431_s1 + $0xe0] ss:$8 sps:$4 sm:$0xff]  }
  0x1c   : > { %500 = vmatprep.subr.bf16.mxu0 %v1000_v9  ;;  %v547_v37 = vmul.f32 %v543_v27, %v286_v21  ;;  %v548_v38 = vmul.f32 %v539_v26, %v287_v28  ;;  %v549_v39 = vmul.f32 %v543_v27, %v288_v29  ;;  %v558_v40 = vmul.f32 %v287_v28, %v287_v28  ;;  %v1033_v8 = vld [vmem:[%s1431_s1 + $0xf4] ss:$8 sps:$4 sm:$0xff]   ;;  %v625_v9 = vld [vmem:[%s1433_s3 + $0x40] sm:$0xff]  ;;  %v1035_v14 = vld [vmem:[%s1431_s1 + $0xf0] ss:$8 sps:$4 sm:$0xff]   ;;  %s274_s14 = scalar_lea.vmem [#allocation2], %s814_s29 }
  0x1d   : > { %v559_v41 = vmul.f32 %v288_v29, %v288_v29  ;;  %v560_v49 = vmul.f32 %v556_v31, %v539_v26  ;;  %v561_v50 = vmul.f32 %v557_v32, %v543_v27  ;;  %922 = vmatpush3.bf16.msra.mxu1 %v919_v44  ;;  %v923_v63 = vpack.c.bf16 %v622_v62, %v621_v61  ;;  %v627_v11 = vld [vmem:[%s1433_s3 + $0x50] sm:$0xff]  ;;  %v630_v19 = vld [vmem:[%s1433_s3 + $0x68] sm:$0xff]  ;;  %v632_v23 = vld [vmem:[%s1433_s3 + $0x78] sm:$0xff]  ;;  %s748_s15 = sshll.u32 %s274_s14, 4  ;;  %s1385_s15 = int_to_ptr.vmem [resolvable:$true] %s748_s15 }
  0x1e   : > { %v550_v43 = vadd.f32 %v547_v37, %v546_v36  ;;  %v562_v46 = vmul.f32 %v558_v40, %v539_v26  ;;  %v553_v48 = vadd.f32 %v549_v39, %v548_v38  ;;  %v927_v4 = vpack.c.bf16 %v624_v3, %v623_v2  ;;  %v631_v22 = vld [vmem:[%s1433_s3 + $0x70] sm:$0xff]  ;;  %s1046_s18 = scalar_lea.vmem %s1385_s15, 256  ;;  %p1053_p0 = scmp.lt.s32.totalorder %s1385_s15, %s1051_s21 }
  0x1f   : > { %501 = vmatpush1.bf16.msra.mxu0 %v1002_v10  ;;  %v563_v47 = vmul.f32 %v559_v41, %v543_v27  ;;  %v564_v54 = vadd.f32 %v561_v50, %v560_v49  ;;  %924 = vmatprep.subr.bf16.mxu1 %v923_v63  ;;  %v626_v10 = vld [vmem:[%s1433_s3 + $0x48] sm:$0xff]  ;;  %v818_v20 = vcombine.low %v1244_v17, %v1246_v18  ;;  %p1047_p11 = scmp.ne.s32.totalorder %s1385_s15, %s1046_s18  ;;  %p1054_p1 = scmp.lt.s32.totalorder %s1052_s22, %s1046_s18 }
  0x20   : > { %502 = vmatprep.subr.bf16.mxu0 %v1003_v12  ;;  %551 = vadd.xlane.f32.xlu0 %v550_v43  ;;  %v931_v12 = vpack.c.bf16 %v626_v10, %v625_v9  ;;  %v943_v24 = vpack.c.bf16 %v632_v23, %v631_v22 }
  0x21   : > { %v567_v51 = vadd.f32 %v563_v47, %v562_v46  ;;  %926 = vmatpush3.bf16.msra.mxu1 %v923_v63  ;;  %p1048_p12 = pnand %p1047_p11, %p1191_p5  ;;  %p1055_p2 = por %p1054_p1, %p1053_p0 }
  0x22   : > { %928 = vmatprep.subr.bf16.mxu1 %v927_v4 }
  0x23   : > { %503 = vmatpush1.bf16.msra.mxu0 %v1005_v13  ;;  %568 = vadd.xlane.f32.xlu1 %v567_v51  ;;  %v628_v13 = vld [vmem:[%s1433_s3 + $0x58] sm:$0xff]  ;;  %p1049_p13 = pneg %p1048_p12 }
  0x24   : > { %504 = vmatprep.subr.bf16.mxu0 %v1006_v16  ;;  %554 = vadd.xlane.f32.xlu0 %v553_v48  ;;  %v935_v15 = vpack.c.bf16 %v628_v13, %v627_v11  ;;  %v629_v16 = vld [vmem:[%s1433_s3 + $0x60] sm:$0xff] }
  0x25   : > { %930 = vmatpush3.bf16.msra.mxu1 %v927_v4  ;;  %v939_v21 = vpack.c.bf16 %v630_v19, %v629_v16  ;;  %p1056_p3 = pnand %p1055_p2, %p1049_p13 }
  0x26   : > { %932 = vmatprep.subr.bf16.mxu1 %v931_v12 }
  0x27   : > { %505 = vmatpush1.bf16.msra.mxu0 %v1008_v25 }
  0x28   : > { %506 = vmatprep.subr.bf16.mxu0 %v1009_v30  ;;  %565 = vadd.xlane.f32.xlu0 %v564_v54 }
  0x29   : > { %934 = vmatpush3.bf16.msra.mxu1 %v931_v12  ;;  %v854_v12 = vld [vmem:[%s1436_s6] ss:$0 sm:$0xff] }
  0x2a   : > { %936 = vmatprep.subr.bf16.mxu1 %v935_v15 }
  0x2b   : > { %507 = vmatpush1.bf16.msra.mxu0 %v1011_v42 }
  0x2c   : > { %508 = vmatprep.subr.bf16.mxu0 %v1012_v45 }
  0x2d   : > { %938 = vmatpush3.bf16.msra.mxu1 %v935_v15 }
  0x2e   : > { %940 = vmatprep.subr.bf16.mxu1 %v939_v21 }
  0x2f   : > { %509 = vmatpush1.bf16.msra.mxu0 %v1014_v52 }
  0x30   : > { %510 = vmatprep.subr.bf16.mxu0 %v1015_v53 }
  0x31   : > { %942 = vmatpush3.bf16.msra.mxu1 %v939_v21 }
  0x32   : > { %944 = vmatprep.subr.bf16.mxu1 %v943_v24 }
  0x33   : > { %511 = vmatpush1.bf16.msra.mxu0 %v1017_v55 }
  0x34   : > { %512 = vmatprep.subr.bf16.mxu0 %v1018_v56 }
  0x35   : > { %946 = vmatpush3.bf16.msra.mxu1 %v943_v24 }
  0x37   : > { %513 = vmatpush1.bf16.msra.mxu0 %v1020_v57  ;;  %v852_v57 = vld [vmem:[%s1434_s4] ss:$0 sm:$0xff] }
  0x38   : > { %514 = vmatprep.subr.bf16.mxu0 %v1021_v58 }
  0x3b   : > { %515 = vmatpush1.bf16.msra.mxu0 %v1023_v59 }
  0x3c   : > { %516 = vmatprep.subr.bf16.mxu0 %v1024_v60  ;;  %v853_v60 = vld [vmem:[%s1435_s5] ss:$0 sm:$0xff] }
  0x3f   : > { %517 = vmatpush1.bf16.msra.mxu0 %v1026_v0 }
  0x40   : > { %518 = vmatprep.subr.bf16.mxu0 %v1027_v1 }
  0x43   : > { %519 = vmatpush1.bf16.msra.mxu0 %v1029_v5 }
  0x44   : > { %520 = vmatprep.subr.bf16.mxu0 %v1030_v6 }
  0x47   : > { %521 = vmatpush1.bf16.msra.mxu0 %v1032_v7 }
  0x48   : > { %522 = vmatprep.subr.bf16.mxu0 %v1033_v8 }
  0x4b   : > { %523 = vmatpush1.bf16.msra.mxu0 %v1035_v14 }
  0x4e   : > { %525 = vmatmul.mubr.bf16.vlgmr.msra.gmra.mrb[0].mxu0 %v818_v20 }
  0xad   : > { %v552_v30 = vpop.xlane.xlu0 %551 }
  0xae   : > { %v570_v36 = vmul.f32 0.003125, %v552_v30 }
  0xb0   : > { %v569_v29 = vpop.xlane.xlu1 %568  ;;  %v574_v43 = vmul.f32 %v570_v36, %v570_v36  ;;  %v589_v59 = vmul.f32 %v852_v57, %v570_v36 }
  0xb1   : > { %v555_v32 = vpop.xlane.xlu0 %554  ;;  %v573_v40 = vmul.f32 0.003125, %v569_v29 }
  0xb2   : > { %v571_v34 = vmul.f32 0.003125, %v555_v32 }
  0xb4   : > { %v575_v39 = vmul.f32 %v571_v34, %v571_v34  ;;  %v590_v58 = vmul.f32 %v852_v57, %v571_v34 }
  0xb5   : > { %v566_v35 = vpop.xlane.xlu0 %565 }
  0xb6   : > { %v572_v44 = vmul.f32 0.003125, %v566_v35  ;;  %v577_v48 = vsub.f32 %v573_v40, %v575_v39 }
  0xb8   : > { %v576_v50 = vsub.f32 %v572_v44, %v574_v43  ;;  %v579_v53 = vadd.f32 1e-05, %v577_v48 }
  0xba   : > { %v578_v54 = vadd.f32 1e-05, %v576_v50  ;;  %1038 = vrsqrt.f32 %v579_v53 }
  0xbc   : > { %1040 = vrsqrt.f32 %v578_v54 }
  0xc4   : > { %v1039_v63 = vpop.eup %1038 }
  0xc6   : > { %v1041_v3 = vpop.eup %1040 }
 0x121   : > { %v1364_v25 = vpop.f32.mrb[0].mxu0 }
 0x122   : > { %v528_v17 = vpop.f32.mrb[1].mxu0  ;;  %v591_v0 = vsub.f32 %v1364_v25, %v589_v59 }
 0x123   : > { %595 = vadd.xlane.f32.xlu1 %v528_v17  ;;  %v530_v18 = vpop.f32.mrb[2].mxu0  ;;  %912 = vmatprep.mubr.f32.mxu1 %v528_v17  ;;  %v601_v26 = vmul.f32 %v528_v17, %v528_v17 }
 0x124   : > { %v532_v27 = vpop.f32.mrb[3].mxu0  ;;  %v592_v61 = vsub.f32 %v530_v18, %v590_v58  ;;  %v593_v11 = vmul.f32 %v1041_v3, %v591_v0 }
 0x125   : > { %913 = vmatmul.mubr.f32.vlgmr.msra.gmra.mrb[0].mxu1 %v532_v27  ;;  %603 = vadd.xlane.f32.xlu0 %v601_v26  ;;  %v602_v28 = vmul.f32 %v532_v27, %v532_v27 }
 0x126   : > { %v594_v9 = vmul.f32 %v1039_v63, %v592_v61 }
 0x127   : > { %597 = vadd.xlane.f32.xlu1 %v532_v27 }
 0x12b   : > { %605 = vadd.xlane.f32.xlu1 %v602_v28 }
 0x1b0   : > { %v596_v31 = vpop.xlane.xlu1 %595 }
 0x1b1   : > { %v599_v37 = vmul.f32 0.0125, %v596_v31 }
 0x1b2   : > { %v604_v41 = vpop.xlane.xlu0 %603 }
 0x1b3   : > { %v609_v46 = vmul.f32 %v599_v37, %v599_v37  ;;  %v607_v47 = vmul.f32 0.0125, %v604_v41  ;;  %v715_v2 = vmul.f32 %v853_v60, %v599_v37 }
 0x1b4   : > { %v598_v33 = vpop.xlane.xlu1 %597 }
 0x1b5   : > { %v600_v42 = vmul.f32 0.0125, %v598_v33  ;;  %v611_v52 = vsub.f32 %v607_v47, %v609_v46 }
 0x1b7   : > { %v610_v49 = vmul.f32 %v600_v42, %v600_v42  ;;  %v613_v56 = vadd.f32 1e-05, %v611_v52  ;;  %v716_v62 = vmul.f32 %v853_v60, %v600_v42 }
 0x1b8   : > { %v606_v38 = vpop.xlane.xlu1 %605 }
 0x1b9   : > { %v608_v45 = vmul.f32 0.0125, %v606_v38 }
 0x1bb   : > { %v612_v51 = vsub.f32 %v608_v45, %v610_v49 }
 0x1bd   : > { %v614_v55 = vadd.f32 1e-05, %v612_v51 }
 0x1bf   : > { %1042 = vrsqrt.f32 %v614_v55 }
 0x1c0   : > { %1044 = vrsqrt.f32 %v613_v56 }
 0x1c9   : > { %v1043_v6 = vpop.eup %1042 }
 0x1ca   : > { %v1045_v8 = vpop.eup %1044 }
 0x1f8   : > { %v914_v1 = vpop.f32.mrb[0].mxu1 }
 0x1f9   : > { %v718_v4 = vsub.f32 %v914_v1, %v716_v62  ;;  %v699_v5 = vpop.f32.mrb[1].mxu1 }
 0x1fa   : > { %v717_v7 = vsub.f32 %v699_v5, %v715_v2 }
 0x1fb   : > { %v720_v10 = vmul.f32 %v1043_v6, %v718_v4 }
 0x1fc   : > { %v719_v13 = vmul.f32 %v1045_v8, %v717_v7 }
 0x1fd   : > { %v722_v14 = vadd.f32 %v720_v10, %v594_v9 }
 0x1fe   : > { %v721_v15 = vadd.f32 %v719_v13, %v593_v11 }
 0x1ff   : > { %v731_v16 = vadd.f32 %v854_v12, %v722_v14 }
 0x200   : > { %v730_v19 = vadd.f32 %v854_v12, %v721_v15 }
 0x201   : > { %733 = vst [vmem:[%s274_s14 + $0x8] sm:$0xff] %v731_v16 }
 0x202   : > { %732 = vst [vmem:[%s274_s14] sm:$0xff] %v730_v19 }
 0x203   : > { %1059 = shalt.err (!%p1056_p3)
}
 0x204   : > { %s1060_s20 = scalar_lea.hbm %s1383_s17, 256  ;;  %s1064_s9 = scalar_lea.hbm %s1437_s7, 512 }
 0x205   : > { %p1061_p4 = scmp.ne.s32.totalorder %s1383_s17, %s1060_s20  ;;  %p1065_p9 = scmp.lt.u32.totalorder %s1383_s17, %s1437_s7 }
 0x206   : > { %p1066_p10 = scmp.lt.u32.totalorder %s1064_s9, %s1060_s20  ;;  %p1068_p12 = scmp.lt.u32.totalorder %s1060_s20, %s1383_s17 }
 0x207   : > { %p1062_p7 = pnand %p1061_p4, %p1191_p5 }
 0x208   : > { %p1067_p11 = por %p1066_p10, %p1065_p9 }
 0x209   : > { %p1063_p8 = pneg %p1062_p7 }
 0x20a   : > { %p1069_p13 = por %p1068_p12, %p1067_p11 }
 0x20c   : > { %p1070_p0 = pnand %p1069_p13, %p1063_p8 }
 0x20e   : > { %1073 = shalt.err (!%p1070_p0)
}
 0x20f   : > { %s1111_s23 = smov 128   ;;  %s1112_s16 = smov 8  }
 0x210   : > { %947 = dma.vmem_to_hbm [thread:$0]  (%p1191_p5), %s1385_s15, 256, %s1383_s17, %s1389_s28, %s1111_s23, %s1111_s23, %s1112_s16  }
 0x211 PF: > { %p953_p1 = scmp.ge.s32.totalorder %s1108_s27, 2  ;;  %s763_s18 = sand.u32 1, %s1096_s24  }
 0x212   : > { %s764_s19 = scalar_lea.sflag [#allocation3], %s763_s18 }
 0x213   : > { %p950_p2 = pnand %p953_p1, %p1195_p6 }
 0x215   : > { %1091 = dma.done.wait (!%p950_p2), %s764_s19, 256  }
 0x216   : > { %1093 = vsyncadd (!%p950_p2), %s764_s19, 4294967040  ;;  %p17_p3 = scmp.ge.s32.totalorder %s1178_s30, 4   ;;  %s1440_s24 = smov %s1100_s25 }
 0x217   : > { %s1441_s25 = smov %s1104_s26  ;;  %s1442_s26 = smov %s1189_s10 }
 0x218   : > { %s1443_s27 = smov %s1178_s30  ;;  %19 = sbr.rel (!%p17_p3) target bundleno = 3 (0x3), region = 83 }
 0x21f   :  { %769 = vsyncpa [#allocation3], 1 }
 0x220   :  { %771 = vsyncpa [#allocation3 + $0x1], 1 }

</bundles_post_ra>
